<compile_context>
chip_gen: v5e
topology: v5e:2x2
jax: 0.10.0
libtpu: 0.0.40
codegen_flags: <defaults>
</compile_context>

<pallas_src>
import jax
import jax.numpy as jnp
from jax.experimental import pallas as pl
from jax.experimental.pallas import tpu as pltpu


# ----------------------------------------------------------------------------
# Fused per-metapath GATConv kernel
# ----------------------------------------------------------------------------
def pallas_gat_layer(x, w_stack, al_t, ar, bias, masks, H, D):
    """Fused GATConv over all metapaths.

    x       (N, Fin)          node features
    w_stack (P, Fin, H*D)     fc weights per metapath
    al_t    (P, H, H*D)       block-diag expanded attn_l (row h holds head h)
    ar      (P, H*D, H)       block-diag expanded attn_r (col h holds head h)
    bias    (P, 1, H*D)
    masks   (P, N, N)         additive mask: 0 on edges, -1e30 elsewhere
    returns (P, N, H*D)       ELU(edge-softmax aggregation) per metapath
    """
    P, N, _ = masks.shape
    Fin = x.shape[1]
    HD = H * D

    def kernel(x_ref, w_ref, al_ref, ar_ref, b_ref, m_ref, o_ref):
        # fc projection for all heads at once (bf16 MXU, f32 accumulate)
        feat = jnp.dot(
            x_ref[...].astype(jnp.bfloat16),
            w_ref[0].astype(jnp.bfloat16),
            preferred_element_type=jnp.float32,
        )                                                     # (N, H*D)
        # el_rows[h, j] = attn_l[h] . feat[j, head h]  (source-side scores)
        el_rows = jax.lax.dot_general(
            al_ref[0], feat, (((1,), (1,)), ((), ())),
            preferred_element_type=jnp.float32)               # (H, N)
        # er_cols[i, h] = attn_r[h] . feat[i, head h]  (dest-side scores)
        er_cols = jnp.dot(feat, ar_ref[0],
                          preferred_element_type=jnp.float32)  # (N, H)
        mask_add = m_ref[0]                                    # (N, N)
        feat_b = feat.astype(jnp.bfloat16)

        head_outs = []
        for h in range(H):                                     # H is small/static
            e = er_cols[:, h:h + 1] + el_rows[h:h + 1, :]      # (N, N)
            e = jnp.where(e > 0, e, 0.2 * e)                   # LeakyReLU(0.2)
            e = e + mask_add                                   # mask non-edges
            m = jnp.max(e, axis=1, keepdims=True)              # softmax over src
            p = jnp.exp(e - m)
            s = jnp.sum(p, axis=1, keepdims=True)              # >= 1 (self-loop)
            alpha = p * pl.reciprocal(s, approx=True)
            head_outs.append(jnp.dot(
                alpha.astype(jnp.bfloat16),
                feat_b[:, h * D:(h + 1) * D],
                preferred_element_type=jnp.float32))           # (N, D)

        rst = jnp.concatenate(head_outs, axis=1) + b_ref[0]    # (N, H*D)
        # ELU; clamp exp argument so the discarded branch never overflows
        o_ref[0] = jnp.where(rst > 0, rst,
                             jnp.exp(jnp.minimum(rst, 0.0)) - 1.0)

    return pl.pallas_call(
        kernel,
        out_shape=jax.ShapeDtypeStruct((P, N, HD), jnp.float32),
        grid=(P,),
        in_specs=[
            pl.BlockSpec((N, Fin), lambda p: (0, 0)),
            pl.BlockSpec((1, Fin, HD), lambda p: (p, 0, 0)),
            pl.BlockSpec((1, H, HD), lambda p: (p, 0, 0)),
            pl.BlockSpec((1, HD, H), lambda p: (p, 0, 0)),
            pl.BlockSpec((1, 1, HD), lambda p: (p, 0, 0)),
            pl.BlockSpec((1, N, N), lambda p: (p, 0, 0)),
        ],
        out_specs=pl.BlockSpec((1, N, HD), lambda p: (p, 0, 0)),
        compiler_params=pltpu.CompilerParams(
            dimension_semantics=("parallel",)),
    )(x, w_stack, al_t, ar, bias, masks)


# ----------------------------------------------------------------------------
# Fused semantic-attention projection + mean(0) kernel
# ----------------------------------------------------------------------------
def _semantic_score_kernel(z_ref, w1_ref, b1_ref, w2_ref, o_ref):
    n = z_ref.shape[1]
    h = jnp.tanh(
        jnp.dot(z_ref[0].astype(jnp.bfloat16),
                w1_ref[...].astype(jnp.bfloat16),
                preferred_element_type=jnp.float32) + b1_ref[...])   # (N, hid)
    t = h * w2_ref[...]                     # VPU multiply instead of (hid,1) matmul
    s = jnp.sum(t, axis=1, keepdims=True)   # (N, 1)
    s = jnp.sum(s, axis=0, keepdims=True)   # (1, 1)
    o_ref[0] = s * (1.0 / n)                # == project(z_p).mean over nodes


def pallas_semantic_scores(z, w1, b1, w2):
    """z (P, N, F) -> per-metapath scalar score (P, 1, 1)."""
    P, N, F = z.shape
    hdim = w1.shape[1]
    return pl.pallas_call(
        _semantic_score_kernel,
        out_shape=jax.ShapeDtypeStruct((P, 1, 1), jnp.float32),
        grid=(P,),
        in_specs=[
            pl.BlockSpec((1, N, F), lambda p: (p, 0, 0)),
            pl.BlockSpec((F, hdim), lambda p: (0, 0)),
            pl.BlockSpec((1, hdim), lambda p: (0, 0)),
            pl.BlockSpec((1, hdim), lambda p: (0, 0)),
        ],
        out_specs=pl.BlockSpec((1, 1, 1), lambda p: (p, 0, 0)),
        compiler_params=pltpu.CompilerParams(
            dimension_semantics=("parallel",)),
    )(z, w1, b1.reshape(1, hdim), w2.reshape(1, hdim))


# ----------------------------------------------------------------------------
# Tiled linear (predict head)
# ----------------------------------------------------------------------------
def _matmul_kernel(x_ref, w_ref, b_ref, o_ref, acc_ref):
    @pl.when(pl.program_id(2) == 0)
    def _():
        acc_ref[...] = jnp.zeros_like(acc_ref)

    acc_ref[...] += jnp.dot(
        x_ref[...].astype(jnp.bfloat16),
        w_ref[...].astype(jnp.bfloat16),
        preferred_element_type=jnp.float32)

    @pl.when(pl.program_id(2) == pl.num_programs(2) - 1)
    def _():
        o_ref[...] = acc_ref[...] + b_ref[...]


def pallas_linear(x, w, b, *, tm=256, tn=256, tk=512):
    """y = x @ w + b with a pipelined 3-D grid and f32 VMEM accumulator.
    Tiles fall back to full-extent blocks when dims don't divide (demo sizes)."""
    m, k = x.shape
    _, n = w.shape
    tm = tm if m % tm == 0 else m
    tn = tn if n % tn == 0 else n
    tk = tk if k % tk == 0 else k
    b2 = b.reshape(1, n).astype(jnp.float32)
    return pl.pallas_call(
        _matmul_kernel,
        out_shape=jax.ShapeDtypeStruct((m, n), jnp.float32),
        grid=(m // tm, n // tn, k // tk),
        in_specs=[
            pl.BlockSpec((tm, tk), lambda i, j, kk: (i, kk)),
            pl.BlockSpec((tk, tn), lambda i, j, kk: (kk, j)),
            pl.BlockSpec((1, tn), lambda i, j, kk: (0, j)),
        ],
        out_specs=pl.BlockSpec((tm, tn), lambda i, j, kk: (i, j)),
        scratch_shapes=[pltpu.VMEM((tm, tn), jnp.float32)],
        compiler_params=pltpu.CompilerParams(
            dimension_semantics=("parallel", "parallel", "arbitrary")),
    )(x.astype(jnp.float32), w.astype(jnp.float32), b2)


# ----------------------------------------------------------------------------
# Model (thin JAX glue around the kernels)
# ----------------------------------------------------------------------------
def han_layer(masks, h, lp):
    z = pallas_gat_layer(h, lp["W"], lp["al_t"], lp["ar"], lp["bias"],
                         masks, lp["H"], lp["D"])              # (P, N, H*D)
    scores = pallas_semantic_scores(z, lp["sem_w1"], lp["sem_b1"], lp["sem_w2"])
    beta = jax.nn.softmax(scores.reshape(-1))                  # (P,)  P=2 softmax
    return jnp.einsum("p,pnf->nf", beta, z)                    # (N, H*D)


def han_forward(params, masks, features):
    feats = features[0]
    for lp in params["layers"]:
        feats = han_layer(masks, feats, lp)
    logits = pallas_linear(feats, params["predict_w"], params["predict_b"])
    return (logits, 1, 2, 3, 4)


# ----------------------------------------------------------------------------
# Deterministic parameter init (packed layouts built once, not per forward)
# ----------------------------------------------------------------------------
def init_params(key, num_paths, in_dim, hid_dim, num_heads, num_classes,
                sem_hidden=128):
    def nk():
        nonlocal key
        key, sub = jax.random.split(key)
        return sub

    layers = []
    in_sizes = [in_dim] + [hid_dim * num_heads[l - 1]
                           for l in range(1, len(num_heads))]
    P = num_paths
    for l, in_size in enumerate(in_sizes):
        H = num_heads[l]
        D = hid_dim
        HD = H * D
        W = 0.1 * jax.random.normal(nk(), (P, in_size, HD), jnp.float32)
        attn_l = 0.1 * jax.random.normal(nk(), (P, H, D), jnp.float32)
        attn_r = 0.1 * jax.random.normal(nk(), (P, H, D), jnp.float32)
        bias = jnp.zeros((P, 1, HD), jnp.float32)
        eye = jnp.eye(H, dtype=jnp.float32)
        # block-diag expansion so el/er become plain matmuls on (N, H*D) feat
        al_t = (attn_l[:, :, None, :] * eye[None, :, :, None]).reshape(P, H, HD)
        ar = (attn_r[:, :, None, :] * eye[None, :, :, None]
              ).reshape(P, H, HD).transpose(0, 2, 1)           # (P, HD, H)
        layers.append({
            "H": H, "D": D,
            "W": W, "al_t": al_t, "ar": ar, "bias": bias,
            "sem_w1": 0.1 * jax.random.normal(nk(), (HD, sem_hidden), jnp.float32),
            "sem_b1": jnp.zeros((sem_hidden,), jnp.float32),
            "sem_w2": 0.1 * jax.random.normal(nk(), (sem_hidden, 1), jnp.float32),
        })

    F_last = hid_dim * num_heads[-1]
    return {
        "layers": layers,
        "predict_w": 0.1 * jax.random.normal(nk(), (F_last, num_classes),
                                             jnp.float32),
        "predict_b": jnp.zeros((num_classes,), jnp.float32),
    }


# ----------------------------------------------------------------------------
# Main
# ----------------------------------------------------------------------------
if __name__ == "__main__":
    key = jax.random.PRNGKey(0)
    N = 16                 # nodes
    num_paths = 2          # metapath graphs
    in_dim = 8
    hid_dim = 8
    num_heads = [2, 2]
    num_classes = 3

    k_adj, k_feat, k_par = jax.random.split(key, 3)

    # Dense adjacencies (A[dst, src]) with self-loops -> additive masks, built once.
    adj_keys = jax.random.split(k_adj, num_paths)
    adjs = []
    for ak in adj_keys:
        a = (jax.random.uniform(ak, (N, N)) < 0.3).astype(jnp.float32)
        a = jnp.maximum(a, jnp.eye(N, dtype=jnp.float32))
        adjs.append(a)
    adj_stack = jnp.stack(adjs, axis=0)                          # (P, N, N)
    masks = jnp.where(adj_stack > 0, 0.0, -1e30).astype(jnp.float32)

    features = [jax.random.normal(k_feat, (N, in_dim), jnp.float32)]
    params = init_params(k_par, num_paths, in_dim, hid_dim, num_heads,
                         num_classes)

    out = han_forward(params, masks, features)
    logits = out[0]
    jax.block_until_ready(logits)
    assert logits.shape == (N, num_classes)
    assert out[1:] == (1, 2, 3, 4)
    print("KERNEL_OK")
</pallas_src>

<mosaic_0001>
module attributes {stable_mosaic.version = 11 : i64} {
  func.func @kernel(%arg0: i32, %arg1: memref<16x8xf32, #tpu.memory_space<vmem>>, %arg2: memref<1x8x16xf32, #tpu.memory_space<vmem>>, %arg3: memref<1x2x16xf32, #tpu.memory_space<vmem>>, %arg4: memref<1x16x2xf32, #tpu.memory_space<vmem>>, %arg5: memref<1x1x16xf32, #tpu.memory_space<vmem>>, %arg6: memref<1x16x16xf32, #tpu.memory_space<vmem>>, %arg7: memref<1x16x16xf32, #tpu.memory_space<vmem>>) attributes {dimension_semantics = [#tpu.dimension_semantics<parallel>], iteration_bounds = array<i64: 2>, scalar_prefetch = 0 : i64, scratch_operands = 0 : i64, tpu.core_type = #tpu.core_type<tc>, window_params = [{pipeline_mode = #tpu.pipeline_mode<synchronous>, transform_indices = @transform_0, window_bounds = array<i64: 16, 8>}, {transform_indices = @transform_1, window_bounds = array<i64: 1, 8, 16>}, {transform_indices = @transform_2, window_bounds = array<i64: 1, 2, 16>}, {transform_indices = @transform_3, window_bounds = array<i64: 1, 16, 2>}, {transform_indices = @transform_4, window_bounds = array<i64: 1, 1, 16>}, {transform_indices = @transform_5, window_bounds = array<i64: 1, 16, 16>}, {transform_indices = @transform_6, window_bounds = array<i64: 1, 16, 16>}]} {
    %c0 = arith.constant 0 : index
    %c0_0 = arith.constant 0 : index
    %0 = vector.load %arg1[%c0, %c0_0] : memref<16x8xf32, #tpu.memory_space<vmem>>, vector<16x8xf32>
    %1 = arith.truncf %0 : vector<16x8xf32> to vector<16x8xbf16>
    %c0_1 = arith.constant 0 : index
    %c0_2 = arith.constant 0 : index
    %c0_3 = arith.constant 0 : index
    %2 = vector.load %arg2[%c0_1, %c0_2, %c0_3] : memref<1x8x16xf32, #tpu.memory_space<vmem>>, vector<1x8x16xf32>
    %3 = vector.shape_cast %2 : vector<1x8x16xf32> to vector<8x16xf32>
    %4 = arith.truncf %3 : vector<8x16xf32> to vector<8x16xbf16>
    %cst = arith.constant dense<0.000000e+00> : vector<16x16xf32>
    %5 = tpu.matmul %1, %4, %cst {dimension_numbers = #tpu.dot_dimension_numbers<[1], [0], [0], [1], [0, 0, 1, 1], [], []>} : vector<16x8xbf16>, vector<8x16xbf16>, vector<16x16xf32> -> vector<16x16xf32>
    %c0_4 = arith.constant 0 : index
    %c0_5 = arith.constant 0 : index
    %c0_6 = arith.constant 0 : index
    %6 = vector.load %arg3[%c0_4, %c0_5, %c0_6] : memref<1x2x16xf32, #tpu.memory_space<vmem>>, vector<1x2x16xf32>
    %7 = vector.shape_cast %6 : vector<1x2x16xf32> to vector<2x16xf32>
    %cst_7 = arith.constant dense<0.000000e+00> : vector<2x16xf32>
    %8 = tpu.matmul %7, %5, %cst_7 {dimension_numbers = #tpu.dot_dimension_numbers<[1], [1], [0], [0], [0, 0, 1, 0], [], []>} : vector<2x16xf32>, vector<16x16xf32>, vector<2x16xf32> -> vector<2x16xf32>
    %c0_8 = arith.constant 0 : index
    %c0_9 = arith.constant 0 : index
    %c0_10 = arith.constant 0 : index
    %9 = vector.load %arg4[%c0_8, %c0_9, %c0_10] : memref<1x16x2xf32, #tpu.memory_space<vmem>>, vector<1x16x2xf32>
    %10 = vector.shape_cast %9 : vector<1x16x2xf32> to vector<16x2xf32>
    %cst_11 = arith.constant dense<0.000000e+00> : vector<16x2xf32>
    %11 = tpu.matmul %5, %10, %cst_11 {dimension_numbers = #tpu.dot_dimension_numbers<[1], [0], [0], [1], [0, 0, 1, 1], [], []>} : vector<16x16xf32>, vector<16x2xf32>, vector<16x2xf32> -> vector<16x2xf32>
    %c0_12 = arith.constant 0 : index
    %c0_13 = arith.constant 0 : index
    %c0_14 = arith.constant 0 : index
    %12 = vector.load %arg6[%c0_12, %c0_13, %c0_14] : memref<1x16x16xf32, #tpu.memory_space<vmem>>, vector<1x16x16xf32>
    %13 = vector.shape_cast %12 : vector<1x16x16xf32> to vector<16x16xf32>
    %14 = arith.truncf %5 : vector<16x16xf32> to vector<16x16xbf16>
    %15 = vector.extract_strided_slice %11 {offsets = [0, 0], sizes = [16, 1], strides = [1, 1]} : vector<16x2xf32> to vector<16x1xf32>
    %16 = vector.extract_strided_slice %8 {offsets = [0, 0], sizes = [1, 16], strides = [1, 1]} : vector<2x16xf32> to vector<1x16xf32>
    %17 = vector.broadcast %15 : vector<16x1xf32> to vector<16x16xf32>
    %18 = vector.broadcast %16 : vector<1x16xf32> to vector<16x16xf32>
    %19 = arith.addf %17, %18 : vector<16x16xf32>
    %cst_15 = arith.constant 0.000000e+00 : f32
    %20 = vector.broadcast %cst_15 : f32 to vector<16x16xf32>
    %21 = arith.cmpf ogt, %19, %20 : vector<16x16xf32>
    %cst_16 = arith.constant 2.000000e-01 : f32
    %22 = vector.broadcast %cst_16 : f32 to vector<16x16xf32>
    %23 = arith.mulf %22, %19 : vector<16x16xf32>
    %24 = arith.select %21, %19, %23 : vector<16x16xi1>, vector<16x16xf32>
    %25 = arith.addf %24, %13 : vector<16x16xf32>
    %cst_17 = arith.constant dense<0xFF800000> : vector<16xf32>
    %26 = vector.multi_reduction <maximumf>, %25, %cst_17 [1] : vector<16x16xf32> to vector<16xf32>
    %27 = vector.shape_cast %26 : vector<16xf32> to vector<16x1xf32>
    %28 = vector.broadcast %27 : vector<16x1xf32> to vector<16x16xf32>
    %29 = arith.subf %25, %28 : vector<16x16xf32>
    %30 = math.exp %29 : vector<16x16xf32>
    %cst_18 = arith.constant dense<0.000000e+00> : vector<16xf32>
    %31 = vector.multi_reduction <add>, %30, %cst_18 [1] : vector<16x16xf32> to vector<16xf32>
    %32 = vector.shape_cast %31 : vector<16xf32> to vector<16x1xf32>
    %33 = tpu.reciprocal %32 {approx = true} : vector<16x1xf32> -> vector<16x1xf32>
    %34 = vector.broadcast %33 : vector<16x1xf32> to vector<16x16xf32>
    %35 = arith.mulf %30, %34 : vector<16x16xf32>
    %36 = arith.truncf %35 : vector<16x16xf32> to vector<16x16xbf16>
    %37 = vector.extract_strided_slice %14 {offsets = [0, 0], sizes = [16, 8], strides = [1, 1]} : vector<16x16xbf16> to vector<16x8xbf16>
    %cst_19 = arith.constant dense<0.000000e+00> : vector<16x8xf32>
    %38 = tpu.matmul %36, %37, %cst_19 {dimension_numbers = #tpu.dot_dimension_numbers<[1], [0], [0], [1], [0, 0, 1, 1], [], []>} : vector<16x16xbf16>, vector<16x8xbf16>, vector<16x8xf32> -> vector<16x8xf32>
    %39 = vector.extract_strided_slice %11 {offsets = [0, 1], sizes = [16, 1], strides = [1, 1]} : vector<16x2xf32> to vector<16x1xf32>
    %40 = vector.extract_strided_slice %8 {offsets = [1, 0], sizes = [1, 16], strides = [1, 1]} : vector<2x16xf32> to vector<1x16xf32>
    %41 = vector.broadcast %39 : vector<16x1xf32> to vector<16x16xf32>
    %42 = vector.broadcast %40 : vector<1x16xf32> to vector<16x16xf32>
    %43 = arith.addf %41, %42 : vector<16x16xf32>
    %cst_20 = arith.constant 0.000000e+00 : f32
    %44 = vector.broadcast %cst_20 : f32 to vector<16x16xf32>
    %45 = arith.cmpf ogt, %43, %44 : vector<16x16xf32>
    %cst_21 = arith.constant 2.000000e-01 : f32
    %46 = vector.broadcast %cst_21 : f32 to vector<16x16xf32>
    %47 = arith.mulf %46, %43 : vector<16x16xf32>
    %48 = arith.select %45, %43, %47 : vector<16x16xi1>, vector<16x16xf32>
    %49 = arith.addf %48, %13 : vector<16x16xf32>
    %cst_22 = arith.constant dense<0xFF800000> : vector<16xf32>
    %50 = vector.multi_reduction <maximumf>, %49, %cst_22 [1] : vector<16x16xf32> to vector<16xf32>
    %51 = vector.shape_cast %50 : vector<16xf32> to vector<16x1xf32>
    %52 = vector.broadcast %51 : vector<16x1xf32> to vector<16x16xf32>
    %53 = arith.subf %49, %52 : vector<16x16xf32>
    %54 = math.exp %53 : vector<16x16xf32>
    %cst_23 = arith.constant dense<0.000000e+00> : vector<16xf32>
    %55 = vector.multi_reduction <add>, %54, %cst_23 [1] : vector<16x16xf32> to vector<16xf32>
    %56 = vector.shape_cast %55 : vector<16xf32> to vector<16x1xf32>
    %57 = tpu.reciprocal %56 {approx = true} : vector<16x1xf32> -> vector<16x1xf32>
    %58 = vector.broadcast %57 : vector<16x1xf32> to vector<16x16xf32>
    %59 = arith.mulf %54, %58 : vector<16x16xf32>
    %60 = arith.truncf %59 : vector<16x16xf32> to vector<16x16xbf16>
    %61 = vector.extract_strided_slice %14 {offsets = [0, 8], sizes = [16, 8], strides = [1, 1]} : vector<16x16xbf16> to vector<16x8xbf16>
    %cst_24 = arith.constant dense<0.000000e+00> : vector<16x8xf32>
    %62 = tpu.matmul %60, %61, %cst_24 {dimension_numbers = #tpu.dot_dimension_numbers<[1], [0], [0], [1], [0, 0, 1, 1], [], []>} : vector<16x16xbf16>, vector<16x8xbf16>, vector<16x8xf32> -> vector<16x8xf32>
    %63 = tpu.concatenate %38, %62 in 1 : vector<16x8xf32>, vector<16x8xf32> -> vector<16x16xf32>
    %c0_25 = arith.constant 0 : index
    %c0_26 = arith.constant 0 : index
    %c0_27 = arith.constant 0 : index
    %64 = vector.load %arg5[%c0_25, %c0_26, %c0_27] : memref<1x1x16xf32, #tpu.memory_space<vmem>>, vector<1x1x16xf32>
    %65 = vector.shape_cast %64 : vector<1x1x16xf32> to vector<1x16xf32>
    %66 = vector.broadcast %65 : vector<1x16xf32> to vector<16x16xf32>
    %67 = arith.addf %63, %66 : vector<16x16xf32>
    %cst_28 = arith.constant 0.000000e+00 : f32
    %68 = vector.broadcast %cst_28 : f32 to vector<16x16xf32>
    %69 = arith.cmpf ogt, %67, %68 : vector<16x16xf32>
    %cst_29 = arith.constant 0.000000e+00 : f32
    %70 = vector.broadcast %cst_29 : f32 to vector<16x16xf32>
    %71 = arith.minimumf %67, %70 : vector<16x16xf32>
    %72 = math.exp %71 : vector<16x16xf32>
    %cst_30 = arith.constant 1.000000e+00 : f32
    %73 = vector.broadcast %cst_30 : f32 to vector<16x16xf32>
    %74 = arith.subf %72, %73 : vector<16x16xf32>
    %75 = arith.select %69, %67, %74 : vector<16x16xi1>, vector<16x16xf32>
    %c0_31 = arith.constant 0 : index
    %c0_32 = arith.constant 0 : index
    %c0_33 = arith.constant 0 : index
    %76 = vector.load %arg7[%c0_31, %c0_32, %c0_33] : memref<1x16x16xf32, #tpu.memory_space<vmem>>, vector<1x16x16xf32>
    %77 = vector.shape_cast %76 : vector<1x16x16xf32> to vector<16x16xf32>
    %78 = vector.shape_cast %75 : vector<16x16xf32> to vector<1x16x16xf32>
    tpu.vector_store %arg7[%c0_31, %c0_32, %c0_33], %78 {strides = array<i32>} : memref<1x16x16xf32, #tpu.memory_space<vmem>>, vector<1x16x16xf32>,
    return
  }
  func.func @transform_0(%arg0: i32) -> (i32, i32) {
    %c0_i32 = arith.constant 0 : i32
    %c0_i32_0 = arith.constant 0 : i32
    %c0_i32_1 = arith.constant 0 : i32
    return %c0_i32, %c0_i32_0 : i32, i32
  }
  func.func @transform_1(%arg0: i32) -> (i32, i32, i32) {
    %c0_i32 = arith.constant 0 : i32
    %c0_i32_0 = arith.constant 0 : i32
    %c0_i32_1 = arith.constant 0 : i32
    return %arg0, %c0_i32, %c0_i32_0 : i32, i32, i32
  }
  func.func @transform_2(%arg0: i32) -> (i32, i32, i32) {
    %c0_i32 = arith.constant 0 : i32
    %c0_i32_0 = arith.constant 0 : i32
    %c0_i32_1 = arith.constant 0 : i32
    return %arg0, %c0_i32, %c0_i32_0 : i32, i32, i32
  }
  func.func @transform_3(%arg0: i32) -> (i32, i32, i32) {
    %c0_i32 = arith.constant 0 : i32
    %c0_i32_0 = arith.constant 0 : i32
    %c0_i32_1 = arith.constant 0 : i32
    return %arg0, %c0_i32, %c0_i32_0 : i32, i32, i32
  }
  func.func @transform_4(%arg0: i32) -> (i32, i32, i32) {
    %c0_i32 = arith.constant 0 : i32
    %c0_i32_0 = arith.constant 0 : i32
    %c0_i32_1 = arith.constant 0 : i32
    return %arg0, %c0_i32, %c0_i32_0 : i32, i32, i32
  }
  func.func @transform_5(%arg0: i32) -> (i32, i32, i32) {
    %c0_i32 = arith.constant 0 : i32
    %c0_i32_0 = arith.constant 0 : i32
    %c0_i32_1 = arith.constant 0 : i32
    return %arg0, %c0_i32, %c0_i32_0 : i32, i32, i32
  }
  func.func @transform_6(%arg0: i32) -> (i32, i32, i32) {
    %c0_i32 = arith.constant 0 : i32
    %c0_i32_0 = arith.constant 0 : i32
    %c0_i32_1 = arith.constant 0 : i32
    return %arg0, %c0_i32, %c0_i32_0 : i32, i32, i32
  }
}

</mosaic_0001>

<bundles_post_ra>
// kernel: tpu_custom_call.1
= control target key start
LH: loop header
LB: loop body
LE: loop exit
PB: predicated region body
PF: predicated region fallthrough
CT: control target
= control target key end

     0   :  { %11 = vsyncpa [#allocation3], 0  ;;  %s1028_s0 = inlined_call_operand.vmem [shape: f32[16,8], index: 0, kind: input, shape index: {}]   ;;  %s1029_s1 = inlined_call_operand.vmem [shape: f32[2,8,16], index: 1, kind: input, shape index: {}]   ;;  %s1030_s2 = inlined_call_operand.vmem [shape: f32[2,2,16], index: 2, kind: input, shape index: {}]   ;;  %s1031_s3 = inlined_call_operand.vmem [shape: f32[2,16,2], index: 3, kind: input, shape index: {}]   ;;  %s1032_s4 = inlined_call_operand.vmem [shape: f32[2,1,16], index: 4, kind: input, shape index: {}]   ;;  %s1033_s5 = inlined_call_operand.vmem [shape: f32[2,16,16], index: 5, kind: input, shape index: {}]   ;;  %s1034_s6 = inlined_call_operand.hbm [shape: f32[2,16,16], index: 6, kind: output, shape index: {}]  }
   0x1   :  { %13 = vsyncpa [#allocation3 + $0x1], 0  ;;  %s888_s21 = smov 0   ;;  %s890_s22 = smov 0  }
   0x2   :  { %s892_s23 = smov 0   ;;  %s894_s24 = smov 0  }
   0x3 LB: > { %s909_s25 = sadd.s32 4294967295, %s846_s24   ;;  %s688_s26 = sadd.s32 4294967294, %s846_s24   ;;  %s846_s24 = sphi %s894_s24, %s1040_s24   ;;  %s842_s23 = sphi %s892_s23, %s1039_s23   ;;  %s838_s22 = sphi %s890_s22, %s1038_s22   ;;  %s834_s21 = sphi %s888_s21, %s1037_s21  }
   0x4   : > { %s913_s27 = sadd.s32 1, %s846_s24   ;;  %s177_s28 = sadd.s32 1, %s842_s23 }
   0x5   : > { %s174_s29 = ssub.s32 %s846_s24, %s913_s27  ;;  %p187_p0 = scmp.ne.s32.totalorder %s842_s23, %s838_s22 }
   0x6   : > { %p175_p1 = scmp.eq.s32.totalorder %s174_s29, 0  ;;  %p188_p2 = scmp.eq.s32.totalorder %s909_s25, 1 }
   0x7   : > { %p193_p3 = scmp.ne.s32.totalorder %s838_s22, %s834_s21  ;;  %p194_p4 = scmp.eq.s32.totalorder %s688_s26, 1 }
   0x8   : > { %s924_s30 = scalar_select %p175_p1, %s842_s23, %s177_s28  }
   0x9   : > { %p926_p5 = por %p188_p2, %p187_p0  ;;  %p930_p6 = por %p194_p4, %p193_p3 }
   0xa   : > { %p691_p7 = scmp.ge.s32.totalorder %s846_s24, 1  ;;  %p251_p8 = scmp.lt.s32.totalorder %s846_s24, 3 }
   0xc   : > { %p252_p9 = pnand %p691_p7, %p251_p8 }
   0xd   : > { %p297_p10 = scmp.lt.s32.totalorder (!%p252_p9), %s909_s25, 1  ;;  %s716_s26 = sshll.u32 (!%p252_p9), %s909_s25, 4 }
   0xe   : > { %255 = sbr.rel (%p252_p9) target bundleno = 944 (0x3b0), region = 44 }
  0x13   : > { %s938_s9 = scalar_select %p297_p10, %s909_s25, 1  ;;  %v319_v0 = vld [vmem:[%s1028_s0] sm:$0xff]  ;;  %vm328_vm0 = vcmask 1043456   ;;  %v320_v2 = vld [vmem:[%s1028_s0 + $0x8] sm:$0xff]  ;;  %vm324_vm1 = vcmask 64512   ;;  %v848_v8 = vmov 1  }
  0x14   : > { %v321_v6 = vpack.c.bf16 %v320_v2, %v319_v0  ;;  %761 = vset.pattern.permute.xlu0 %v848_v8  ;;  %v849_v9 = vmov 0   ;;  %vm347_vm2 = vcmask 130048  }
  0x15   : > { %s693_s10 = sshll.u32 %s938_s9, 3  ;;  %s714_s11 = sshll.u32 %s938_s9, 4  ;;  %762 = vset.pattern.permute.xlu1 %v849_v9 }
  0x16   : > { %s300_s14 = scalar_lea.vmem %s1029_s1, %s693_s10  ;;  %s309_s19 = scalar_lea.vmem %s1031_s3, %s714_s11 }
  0x17   : > { %v322_v1 = vld [vmem:[%s300_s14] sm:$0xff]  ;;  %v378_v3 = vld [vmem:[%s309_s19 + $0x8] sm:$0xff]  ;;  %s694_s28 = sshll.u32 %s938_s9, 1  ;;  %s317_s15 = scalar_lea.vmem %s1033_s5, %s714_s11 }
  0x18   : > { %v323_v4 = vpack.c.bf16 %v322_v1, %v322_v1  ;;  %393 = vmatpush.msra.mxu2 %v378_v3  ;;  %v377_v7 = vld [vmem:[%s309_s19] sm:$0xff]  ;;  %s304_s12 = scalar_lea.vmem %s1030_s2, %s694_s28  ;;  %v403_v40 = vld [vmem:[%s317_s15 + $0x8] sm:$0xff]  ;;  %s850_s11 = smov 120  }
  0x19   : > { %v346_v17 = vld [vmem:[%s304_s12] sm:$0x3]  ;;  %s312_s18 = scalar_lea.vmem %s1032_s4, %s938_s9  ;;  %s851_s19 = smov 8  }
  0x1a   : > { %v330_v5 = vsel %vm328_vm0, %v323_v4, 0  ;;  %394 = vmatpush.msra.mxu2 %v377_v7  ;;  %v402_v27 = vld [vmem:[%s317_s15] sm:$0xff]  ;;  %s294_s9 = sand.u32 1, %s838_s22   ;;  %s577_s12 = scalar_lea.hbm %s1034_s6, %s716_s26 }
  0x1b   : > { %339 = vmatpush.bf16.msra.mxu0 %v330_v5  ;;  %s692_s20 = sshll.u32 %s294_s9, 4  ;;  %s580_s14 = sshll.u32 %s577_s12, 4  ;;  %s581_s14 = int_to_ptr.hbm [resolvable:$true] %s580_s14 }
  0x1c   : > { %s296_s28 = scalar_lea.vmem [#allocation2], %s692_s20  ;;  %s566_s25 = scalar_lea.sflag [#allocation3], %s294_s9 }
  0x1d   : > { %s578_s13 = sshll.u32 %s296_s28, 4  ;;  %s798_s15 = sshra.s32 %s581_s14, 4  ;;  %s579_s13 = int_to_ptr.vmem [resolvable:$true] %s578_s13  ;;  %s799_s15 = int_to_ptr.hbm [resolvable:$true] %s798_s15 }
  0x1e   : > { %699 = vmatmul.msk.bf16.vlgmr.msra.gmra.mxu0 %vm324_vm1, %v321_v6  ;;  %p805_p0 = scmp.lt.s32.totalorder %s799_s15, %s1034_s6 }
  0x9b   : > { %v341_v10 = vpop.f32.mrf.mxu0 }
  0x9c   : > { %703 = vmatmul.msk.f32.vlgmr.msra.gmra.mxu2 %vm347_vm2, %v341_v10  ;;  %v404_v11 = vpack.c.bf16 %v341_v10, %v341_v10 }
  0x9e   : > { %v452_v14 = vunpack.c.l.b16 %v404_v11 }
  0xa3   : > { %v343_v12 = vpop.f32.mrf.mxu0 }
  0xa4   : > { %v405_v13 = vpack.c.bf16 %v343_v12, %v343_v12  ;;  %700 = vmatpush.xpose.msk.msrb.mxu0 %vm347_vm2, %v343_v12  ;;  %704 = vmatmul.msk.f32.gmra.mxu2 %vm347_vm2, %v343_v12 }
  0xa6   : > { %v453_v15 = vunpack.c.l.b16 %v405_v13 }
  0xa8   : > { %701 = vmatpush.xpose.msk.msrb.mxu0 %vm347_vm2, %v341_v10  ;;  %v965_v16 = vpack.c.b16 %v453_v15, %v452_v14 }
  0xaa   : > { %466 = vmatpush.bf16.msra.mxu3 %v965_v16 }
  0xab   : > { %702 = vmatmul.msk.f32.vlgmr.msrb.gmra.mxu0 %vm347_vm2, %v346_v17 }
 0x11f   : > { %v396_v18 = vpop.f32.mrf.mxu2 }
 0x120   : > { %408 = vperm.xlu1 %762, %v396_v18   ;;  %474 = vperm.xlu0 %761, %v396_v18  }
 0x127   : > { %v399_v19 = vpop.f32.mrf.mxu2 }
 0x128   : > { %413 = vperm.xlu1 %762, %v399_v19   ;;  %478 = vperm.xlu0 %761, %v399_v19   ;;  %v374_v20 = vpop.f32.mrf.mxu0 }
 0x129   : > { %v416_v21 = vperm.slane %v374_v20, 0  ;;  %v481_v22 = vperm.slane %v374_v20, 1 }
 0x192   : > { %v409_v23 = vpop.permute.xlu1 %408  ;;  %v475_v24 = vpop.permute.xlu0 %474 }
 0x193   : > { %v417_v25 = vadd.f32 %v416_v21, %v409_v23  ;;  %v482_v26 = vadd.f32 %v481_v22, %v475_v24  ;;  %v763_v23 = vld [vmem:[%s312_s18] ss:$0 sm:$0xff]  ;;  %s804_s18 = scalar_lea.hbm %s1034_s6, 32 }
 0x195   : > { %vm419_vm3 = vcmp.gt.f32.partialorder %v417_v25, 0.0  ;;  %v421_v28 = vmul.f32 0.2, %v417_v25  ;;  %v486_v29 = vmul.f32 0.2, %v482_v26  ;;  %vm484_vm4 = vcmp.gt.f32.partialorder %v482_v26, 0.0 }
 0x197   : > { %v488_v30 = vsel %vm484_vm4, %v482_v26, %v486_v29  ;;  %v423_v31 = vsel %vm419_vm3, %v417_v25, %v421_v28 }
 0x198   : > { %v490_v32 = vadd.f32 %v488_v30, %v402_v27  ;;  %v425_v33 = vadd.f32 %v423_v31, %v402_v27 }
 0x19a   : > { %v414_v34 = vpop.permute.xlu1 %413  ;;  %v479_v35 = vpop.permute.xlu0 %478  ;;  %v492_v36 = vsel %vm347_vm2, %v490_v32, -inf  ;;  %v427_v37 = vsel %vm347_vm2, %v425_v33, -inf }
 0x19b   : > { %v418_v38 = vadd.f32 %v416_v21, %v414_v34  ;;  %v483_v39 = vadd.f32 %v481_v22, %v479_v35  ;;  %493 = vmax.xlane.f32.xlu2 %v492_v36  ;;  %428 = vmax.xlane.f32.xlu0 %v427_v37 }
 0x19d   : > { %vm420_vm5 = vcmp.gt.f32.partialorder %v418_v38, 0.0  ;;  %v422_v41 = vmul.f32 0.2, %v418_v38  ;;  %vm485_vm6 = vcmp.gt.f32.partialorder %v483_v39, 0.0  ;;  %v487_v42 = vmul.f32 0.2, %v483_v39 }
 0x19f   : > { %v489_v43 = vsel %vm485_vm6, %v483_v39, %v487_v42  ;;  %v424_v44 = vsel %vm420_vm5, %v418_v38, %v422_v41 }
 0x1a0   : > { %v491_v45 = vadd.f32 %v489_v43, %v403_v40  ;;  %v426_v46 = vadd.f32 %v424_v44, %v403_v40 }
 0x1a2   : > { %v495_v47 = vsel %vm347_vm2, %v491_v45, -inf  ;;  %v430_v48 = vsel %vm347_vm2, %v426_v46, -inf }
 0x1a3   : > { %496 = vmax.xlane.f32.xlu2 %v495_v47  ;;  %431 = vmax.xlane.f32.xlu1 %v430_v48 }
 0x20e   : > { %v494_v49 = vpop.xlane.xlu2 %493  ;;  %v429_v0 = vpop.xlane.xlu0 %428 }
 0x20f   : > { %v498_v50 = vsub.f32 %v490_v32, %v494_v49  ;;  %v433_v1 = vsub.f32 %v425_v33, %v429_v0 }
 0x211   : > { %v500_v51 = vmul.f32 1.442695, %v498_v50  ;;  %v435_v2 = vmul.f32 1.442695, %v433_v1 }
 0x213   : > { %764 = vpow2.f32 %v500_v51 }
 0x216   : > { %v497_v52 = vpop.xlane.xlu2 %496  ;;  %v432_v53 = vpop.xlane.xlu1 %431 }
 0x217   : > { %v499_v54 = vsub.f32 %v491_v45, %v497_v52  ;;  %v434_v55 = vsub.f32 %v426_v46, %v432_v53 }
 0x219   : > { %v765_v56 = vpop.eup %764  ;;  %v502_v57 = vmul.f32 1.442695, %v499_v54  ;;  %v437_v58 = vmul.f32 1.442695, %v434_v55 }
 0x21a   : > { %v504_v59 = vsel %vm347_vm2, %v765_v56, 0.0 }
 0x21b   : > { %766 = vpow2.f32 %v502_v57  ;;  %505 = vadd.xlane.f32.xlu2 %v504_v59 }
 0x21c   : > { %768 = vpow2.f32 %v437_v58 }
 0x21d   : > { %770 = vpow2.f32 %v435_v2 }
 0x221   : > { %v767_v60 = vpop.eup %766 }
 0x222   : > { %v769_v61 = vpop.eup %768  ;;  %v507_v62 = vsel %vm347_vm2, %v767_v60, 0.0 }
 0x223   : > { %508 = vadd.xlane.f32.xlu2 %v507_v62  ;;  %v442_v63 = vsel %vm347_vm2, %v769_v61, 0.0  ;;  %v771_v3 = vpop.eup %770 }
 0x224   : > { %443 = vadd.xlane.f32.xlu0 %v442_v63  ;;  %v439_v4 = vsel %vm347_vm2, %v771_v3, 0.0 }
 0x23b   : > { %515 = vrot.lane.b32.xlu2 %v965_v16, %s850_s11  ;;  %s800_s11 = scalar_lea.hbm %s799_s15, 16 }
 0x23c   : > { %p801_p11 = scmp.ne.s32.totalorder %s799_s15, %s800_s11  ;;  %p806_p1 = scmp.lt.s32.totalorder %s804_s18, %s800_s11 }
 0x23e   : > { %p802_p12 = pnand %p801_p11, %p926_p5  ;;  %p807_p2 = por %p806_p1, %p805_p0 }
 0x240   : > { %p803_p13 = pneg %p802_p12 }
 0x242   : > { %p808_p3 = pnand %p807_p2, %p803_p13 }
 0x264   : > { %440 = vadd.xlane.f32.xlu2 %v439_v4 }
 0x28e   : > { %v506_v5 = vpop.xlane.xlu2 %505 }
 0x28f   : > { %772 = vrcp.f32 %v506_v5 }
 0x295   : > { %v773_v7 = vpop.eup %772 }
 0x296   : > { %v509_v6 = vpop.xlane.xlu2 %508  ;;  %v512_v10 = vmul.f32 %v773_v7, %v765_v56 }
 0x297   : > { %774 = vrcp.f32 %v509_v6  ;;  %v444_v13 = vpop.xlane.xlu0 %443 }
 0x298   : > { %776 = vrcp.f32 %v444_v13 }
 0x29d   : > { %v775_v8 = vpop.eup %774 }
 0x29e   : > { %v516_v9 = vpop.permute.xlu2 %515  ;;  %v513_v11 = vmul.f32 %v775_v8, %v767_v60  ;;  %v777_v15 = vpop.eup %776 }
 0x29f   : > { %528 = vmatpush.bf16.msra.mxu1 %v516_v9  ;;  %v448_v18 = vmul.f32 %v777_v15, %v769_v61 }
 0x2a0   : > { %v514_v12 = vpack.c.bf16 %v513_v11, %v512_v10 }
 0x2a2   : > { %706 = vmatmul.msk.bf16.vlgmr.msra.gmra.mxu1 %vm347_vm2, %v514_v12 }
 0x2d7   : > { %v441_v14 = vpop.xlane.xlu2 %440 }
 0x2d8   : > { %778 = vrcp.f32 %v441_v14 }
 0x2de   : > { %v779_v16 = vpop.eup %778 }
 0x2df   : > { %v447_v17 = vmul.f32 %v779_v16, %v771_v3 }
 0x2e1   : > { %v449_v19 = vpack.c.bf16 %v448_v18, %v447_v17 }
 0x2e3   : > { %705 = vmatmul.msk.bf16.vlgmr.msra.gmra.mxu3 %vm347_vm2, %v449_v19 }
 0x31f   : > { %v530_v20 = vpop.f32.mrf.mxu1 }
 0x320   : > { %537 = vrot.lane.b32.xlu1 %v530_v20, %s851_s19 }
 0x327   : > { %v532_v21 = vpop.f32.mrf.mxu1 }
 0x328   : > { %539 = vrot.lane.b32.xlu0 %v532_v21, %s851_s19 }
 0x366   : > { %v468_v22 = vpop.f32.mrf.mxu3 }
 0x36e   : > { %v470_v29 = vpop.f32.mrf.mxu3 }
 0x392   : > { %v538_v24 = vpop.permute.xlu1 %537 }
 0x393   : > { %v543_v25 = vsel %vm324_vm1, %v468_v22, %v538_v24 }
 0x394   : > { %v549_v26 = vadd.f32 %v763_v23, %v543_v25 }
 0x396   : > { %v553_v27 = vmin.f32 %v549_v26, 0.0  ;;  %vm551_vm7 = vcmp.gt.f32.partialorder %v549_v26, 0.0 }
 0x398   : > { %v555_v28 = vmul.f32 1.442695, %v553_v27 }
 0x39a   : > { %780 = vpow2.f32 %v555_v28  ;;  %v540_v30 = vpop.permute.xlu0 %539 }
 0x39b   : > { %v544_v31 = vsel %vm324_vm1, %v470_v29, %v540_v30 }
 0x39c   : > { %v550_v32 = vadd.f32 %v763_v23, %v544_v31 }
 0x39e   : > { %v554_v33 = vmin.f32 %v550_v32, 0.0  ;;  %vm552_vm8 = vcmp.gt.f32.partialorder %v550_v32, 0.0 }
 0x3a0   : > { %v781_v34 = vpop.eup %780  ;;  %v557_v35 = vmul.f32 1.442695, %v554_v33 }
 0x3a1   : > { %v707_v36 = vadd.f32 -1.0, %v781_v34 }
 0x3a2   : > { %782 = vpow2.f32 %v557_v35 }
 0x3a3   : > { %v561_v37 = vsel %vm551_vm7, %v549_v26, %v707_v36 }
 0x3a4   : > { %563 = vst.msk [vmem:[%s296_s28] sm:$0xff] %vm347_vm2, %v561_v37 }
 0x3a8   : > { %v783_v38 = vpop.eup %782 }
 0x3a9   : > { %v708_v39 = vadd.f32 -1.0, %v783_v38 }
 0x3ab   : > { %v562_v40 = vsel %vm552_vm8, %v550_v32, %v708_v39 }
 0x3ac   : > { %564 = vst.msk [vmem:[%s296_s28 + $0x8] sm:$0xff] %vm347_vm2, %v562_v40 }
 0x3ad   : > { %811 = shalt.err (!%p808_p3)
}
 0x3ae   : > { %s852_s9 = smov 128  }
 0x3af   : > { %717 = dma.vmem_to_hbm [thread:$0]  (%p926_p5), %s579_s13, 256, %s581_s14, %s566_s25, %s852_s9, %s852_s9, %s851_s19  }
 0x3b0 PF: > { %p723_p4 = scmp.ge.s32.totalorder %s846_s24, 2  ;;  %s595_s28 = sand.u32 1, %s834_s21  }
 0x3b1   : > { %s596_s29 = scalar_lea.sflag [#allocation3], %s595_s28 }
 0x3b2   : > { %p720_p7 = pnand %p723_p4, %p930_p6 }
 0x3b4   : > { %p721_p8 = pneg %p720_p7 }
 0x3b6   : > { %829 = dma.done.wait (%p721_p8), %s596_s29, 256  }
 0x3b7   : > { %831 = vsyncadd (%p721_p8), %s596_s29, 4294967040  ;;  %p16_p9 = scmp.ge.s32.totalorder %s913_s27, 4   ;;  %s1037_s21 = smov %s838_s22 }
 0x3b8   : > { %s1038_s22 = smov %s842_s23  ;;  %s1039_s23 = smov %s924_s30 }
 0x3b9   : > { %s1040_s24 = smov %s913_s27  ;;  %18 = sbr.rel (!%p16_p9) target bundleno = 3 (0x3), region = 91 }
 0x3be   :  { %602 = vsyncpa [#allocation3], 1 }
 0x3bf   :  { %604 = vsyncpa [#allocation3 + $0x1], 1 }

</bundles_post_ra>
